<compile_context>
chip_gen: v6e
topology: v6e:2x2x1
jax: 0.10.0
libtpu: 0.0.40
codegen_flags: <defaults>
</compile_context>

<pallas_src>
import math
import functools

import jax
import jax.numpy as jnp
from jax.experimental import pallas as pl
from jax.experimental.pallas import tpu as pltpu

_LANE = 128  # lane width: pad the batch so the output store is lane-dense


def _annealer_kernel(epoch_ref, out_ref, *, cycle_duration, inv_annealing, beta):
    # Elementwise over a (1, n_pad) tile; constants are baked in at trace time.
    epoch = epoch_ref[...]                                             # int32
    cycle_epoch = jnp.mod(epoch - jnp.int32(1), jnp.int32(cycle_duration))
    # Multiply by precomputed reciprocal instead of dividing.
    val = jnp.float32(beta) + cycle_epoch.astype(jnp.float32) * jnp.float32(
        inv_annealing
    )
    out_ref[...] = jnp.minimum(jnp.float32(1.0), val)


@functools.lru_cache(maxsize=None)
def _build_annealer(n, total_iterations, num_cycles, annealing_fraction, beta):
    """Returns a cached, jitted callable: int32 (n,) epochs -> float32 (n,)."""
    cycle_duration = math.ceil(total_iterations / num_cycles)
    annealing_duration = cycle_duration * annealing_fraction
    if annealing_duration <= 0:
        raise ValueError(
            "annealing_duration must be > 0 (got "
            f"{annealing_duration}); the reference would raise ZeroDivisionError."
        )
    inv_annealing = 1.0 / annealing_duration

    n_pad = max(_LANE, ((n + _LANE - 1) // _LANE) * _LANE)

    kernel = functools.partial(
        _annealer_kernel,
        cycle_duration=cycle_duration,
        inv_annealing=inv_annealing,
        beta=beta,
    )

    launch = pl.pallas_call(
        kernel,
        out_shape=jax.ShapeDtypeStruct((1, n_pad), jnp.float32),
        in_specs=[pl.BlockSpec(memory_space=pltpu.MemorySpace.VMEM)],
        out_specs=pl.BlockSpec(memory_space=pltpu.MemorySpace.VMEM),
    )

    @jax.jit
    def run(epochs):
        e = epochs.astype(jnp.int32).reshape((1, n))
        # Pad with a valid epoch (1) so the whole lane-dense tile is well defined.
        e = jnp.pad(e, ((0, 0), (0, n_pad - n)), constant_values=1)
        out = launch(e)
        return out[0, :n]  # slice happens on-device, inside the jit

    return run


def cyclical_annealer_batch(
    epochs,
    *,
    total_iterations,
    num_cycles=4,
    annealing_fraction_per_cycle=0.5,
    beta=0.1,
):
    """Evaluate the annealer for a whole batch of epochs in one kernel launch."""
    epochs = jnp.asarray(epochs, dtype=jnp.int32).reshape((-1,))
    run = _build_annealer(
        int(epochs.shape[0]),
        int(total_iterations),
        int(num_cycles),
        float(annealing_fraction_per_cycle),
        float(beta),
    )
    return run(epochs)


def cyclical_annealer(
    epoch,
    *,
    total_iterations,
    num_cycles=4,
    annealing_fraction_per_cycle=0.5,
    beta=0.1,
):
    """Single-epoch API (matches CyclicalAnnealer.forward). Returns float32 ()."""
    out = cyclical_annealer_batch(
        jnp.asarray(epoch, dtype=jnp.int32).reshape((1,)),
        total_iterations=total_iterations,
        num_cycles=num_cycles,
        annealing_fraction_per_cycle=annealing_fraction_per_cycle,
        beta=beta,
    )
    return out[0]


def _reference(epoch, total_iterations, num_cycles, frac, beta):
    cycle_duration = math.ceil(total_iterations / num_cycles)
    annealing_duration = cycle_duration * frac
    cycle_epoch = (epoch - 1) % cycle_duration
    return min(1, beta + cycle_epoch / annealing_duration)


if __name__ == "__main__":
    total_iterations = 100
    num_cycles = 4
    frac = 0.5
    beta = 0.1

    key = jax.random.PRNGKey(0)
    epochs = jax.random.randint(
        key, (6,), minval=1, maxval=total_iterations + 1, dtype=jnp.int32
    )  # stays device-resident

    # One batched launch for all epochs (compiled once, cached).
    outs = cyclical_annealer_batch(
        epochs,
        total_iterations=total_iterations,
        num_cycles=num_cycles,
        annealing_fraction_per_cycle=frac,
        beta=beta,
    )
    outs = jax.block_until_ready(outs)

    epochs_host = jax.device_get(epochs).tolist()
    outs_host = jax.device_get(outs).tolist()

    ok = True
    for e, o in zip(epochs_host, outs_host):
        ref = _reference(e, total_iterations, num_cycles, frac, beta)
        if abs(float(o) - float(ref)) > 1e-5:
            ok = False
            print(f"MISMATCH epoch={e}: kernel={float(o)} ref={ref}")

    # Also exercise the single-epoch path (reuses the cached executable for n=1).
    single = cyclical_annealer(
        epochs_host[0],
        total_iterations=total_iterations,
        num_cycles=num_cycles,
        annealing_fraction_per_cycle=frac,
        beta=beta,
    )
    single = jax.block_until_ready(single)
    ref0 = _reference(epochs_host[0], total_iterations, num_cycles, frac, beta)
    if abs(float(single) - float(ref0)) > 1e-5:
        ok = False
        print(f"MISMATCH (single) epoch={epochs_host[0]}: {float(single)} ref={ref0}")

    if ok:
        print("KERNEL_OK")
</pallas_src>

<mosaic_0001>
module attributes {stable_mosaic.version = 11 : i64} {
  func.func @_annealer_kernel(%arg0: memref<1x128xi32, #tpu.memory_space<vmem>>, %arg1: memref<1x128xf32, #tpu.memory_space<vmem>>) attributes {dimension_semantics = [], scalar_prefetch = 0 : i64, scratch_operands = 0 : i64, tpu.core_type = #tpu.core_type<tc>} {
    %c0 = arith.constant 0 : index
    %c0_0 = arith.constant 0 : index
    %0 = vector.load %arg0[%c0, %c0_0] : memref<1x128xi32, #tpu.memory_space<vmem>>, vector<1x128xi32>
    %c1_i32 = arith.constant 1 : i32
    %1 = vector.broadcast %c1_i32 : i32 to vector<1x128xi32>
    %2 = arith.subi %0, %1 : vector<1x128xi32>
    %c25_i32 = arith.constant 25 : i32
    %c0_i32 = arith.constant 0 : i32
    %3 = arith.cmpi eq, %c25_i32, %c0_i32 : i32
    %c1_i32_1 = arith.constant 1 : i32
    %4 = arith.select %3, %c1_i32_1, %c25_i32 : i32
    %5 = vector.broadcast %4 : i32 to vector<1x128xi32>
    %6 = arith.remsi %2, %5 : vector<1x128xi32>
    %c0_i32_2 = arith.constant 0 : i32
    %7 = vector.broadcast %c0_i32_2 : i32 to vector<1x128xi32>
    %8 = arith.cmpi ne, %6, %7 : vector<1x128xi32>
    %c0_i32_3 = arith.constant 0 : i32
    %9 = vector.broadcast %c0_i32_3 : i32 to vector<1x128xi32>
    %10 = arith.cmpi slt, %6, %9 : vector<1x128xi32>
    %c0_i32_4 = arith.constant 0 : i32
    %11 = arith.cmpi slt, %4, %c0_i32_4 : i32
    %12 = vector.broadcast %11 : i1 to vector<1x128xi1>
    %13 = vector.broadcast %12 : vector<1x128xi1> to vector<1x128xi1>
    %14 = arith.xori %10, %13 : vector<1x128xi1>
    %15 = arith.andi %14, %8 : vector<1x128xi1>
    %16 = vector.broadcast %4 : i32 to vector<1x128xi32>
    %17 = arith.addi %6, %16 : vector<1x128xi32>
    %18 = arith.select %15, %17, %6 : vector<1x128xi1>, vector<1x128xi32>
    %19 = arith.sitofp %18 : vector<1x128xi32> to vector<1x128xf32>
    %cst = arith.constant 8.000000e-02 : f32
    %20 = vector.broadcast %cst : f32 to vector<1x128xf32>
    %21 = arith.mulf %19, %20 : vector<1x128xf32>
    %cst_5 = arith.constant 1.000000e-01 : f32
    %22 = vector.broadcast %cst_5 : f32 to vector<1x128xf32>
    %23 = arith.addf %22, %21 : vector<1x128xf32>
    %cst_6 = arith.constant 1.000000e+00 : f32
    %24 = vector.broadcast %cst_6 : f32 to vector<1x128xf32>
    %25 = arith.minimumf %24, %23 : vector<1x128xf32>
    %c0_7 = arith.constant 0 : index
    %c0_8 = arith.constant 0 : index
    %26 = vector.load %arg1[%c0_7, %c0_8] : memref<1x128xf32, #tpu.memory_space<vmem>>, vector<1x128xf32>
    tpu.vector_store %arg1[%c0_7, %c0_8], %25 {strides = array<i32>} : memref<1x128xf32, #tpu.memory_space<vmem>>, vector<1x128xf32>,
    return
  }
}

</mosaic_0001>

<bundles_post_ra>
// kernel: run.1
= control target key start
LH: loop header
LB: loop body
LE: loop exit
PB: predicated region body
PF: predicated region fallthrough
CT: control target
= control target key end

     0   :  { %s59_s0 = inlined_call_operand.vmem [shape: s32[1,128], index: 0, kind: input, shape index: {}]   ;;  %s60_s1 = inlined_call_operand.vmem [shape: f32[1,128], index: 1, kind: output, shape index: {}]  }
   0x1   :  { %v8_v0 = vld [vmem:[%s59_s0] sm:$0x1] }
   0x2   :  { %v35_v1 = vadd.s32 4294967295, %v8_v0 }
   0x4   :  { %v11_v2 = vsub.s32 0, %v35_v1  ;;  %vm10_vm0 = vcmp.lt.s32.totalorder %v35_v1, 0 }
   0x6   :  { %v36_v3 = vmin.u32 %v35_v1, %v11_v2 }
   0x8   :  { %v52_v4 = vmul.u32.u64.low 2748779070, %v36_v3  ;;  %v53_v5 = vmul.u32.u64.high 2748779070, %v36_v3, %v52_v4 }
   0xa   :  { %v16_v6 = vshrl.u32 %v53_v5, 4 }
   0xc   :  { %v17_v7 = vmul.u32 25, %v16_v6 }
   0xe   :  { %v18_v8 = vsub.s32 %v36_v3, %v17_v7 }
  0x10   :  { %v19_v9 = vsub.s32 0, %v18_v8 }
  0x12   :  { %v20_v10 = vsel %vm10_vm0, %v19_v9, %v18_v8 }
  0x13   :  { %vm21_vm1 = vcmp.ne.s32.totalorder %v20_v10, 0  ;;  %vm22_vm2 = vcmp.lt.s32.totalorder %v20_v10, 0  ;;  %v24_v11 = vadd.s32 25, %v20_v10 }
  0x14   :  { %vm23_vm3 = vmand %vm22_vm2, %vm21_vm1 }
  0x15   :  { %v25_v12 = vsel %vm23_vm3, %v24_v11, %v20_v10 }
  0x16   :  { %v26_v13 = vcvt.s32.f32 %v25_v12 }
  0x18   :  { %v27_v14 = vmul.f32 0.08, %v26_v13 }
  0x1a   :  { %v28_v15 = vadd.f32 0.1, %v27_v14 }
  0x1c   :  { %v29_v16 = vmin.f32 %v28_v15, 1.0 }
  0x1e   :  { %30 = vst [vmem:[%s60_s1] sm:$0x1] %v29_v16 }

</bundles_post_ra>
